<compile_context>
chip_gen: v7x
topology: tpu7x:2x2x1
jax: 0.10.0
libtpu: 0.0.40
codegen_flags: <defaults>
</compile_context>

<pallas_src>
import functools

import jax
import jax.numpy as jnp
from jax.experimental import pallas as pl
from jax.experimental.pallas import tpu as pltpu


_MAX_TILE_LANES = 8192  # caps the unrolled in-kernel chunk loop at 64 iterations


def _round_up(v, m):
    return ((v + m - 1) // m) * m


def _largest_divisor_leq(n, cap, multiple=1):
    """Largest d dividing n with d <= cap and d % multiple == 0 (0 if none)."""
    best = 0
    d = 1
    while d * d <= n:
        if n % d == 0:
            for cand in (d, n // d):
                if cand <= cap and cand % multiple == 0 and cand > best:
                    best = cand
        d += 1
    return best


def _vmem_budgets():
    """(x double-buffer budget, scoped vmem limit) from per-core VMEM capacity."""
    cap = 64 * 1024 * 1024  # conservative default == v7x physical VMEM
    try:
        info = pltpu.get_tpu_info()
        cap = int(getattr(info, "vmem_capacity_bytes", cap))
    except Exception:
        pass
    cap = max(32 * 1024 * 1024, min(cap, 128 * 1024 * 1024))
    x_budget = int(cap * 0.60)    # bytes for the double-buffered x stream
    vmem_limit = int(cap * 0.75)  # scoped limit; leaves headroom for Mosaic
    return x_budget, vmem_limit


def _choose_tiling(B, C, HW, itemsize, x_budget):
    """Pick (b_blk, tile, n_bblk, n_tiles, split_axis, n_split)."""
    c_pad = _round_up(max(C, 1), 8)

    # Lanes of x per batch row that fit a double-buffered budget.
    max_lanes = x_budget // (2 * c_pad * itemsize)
    max_lanes = max(128, (max_lanes // 128) * 128)
    lane_cap = min(max(HW, 128), max_lanes, _MAX_TILE_LANES)

    if HW % 128 == 0:
        tile = _largest_divisor_leq(HW, lane_cap, multiple=128)
        if tile == 0:
            tile = 128
    else:
        # TODO(synk): masked/partial last tile for large HW not divisible by 128.
        tile = HW
    n_tiles = HW // tile

    # Batch blocking: grow the per-step block toward ~4 MiB, capped by budget.
    per_b_bytes = c_pad * tile * itemsize
    cap_by_budget = max(1, x_budget // (2 * per_b_bytes))
    cap_by_target = max(1, (4 * 1024 * 1024) // per_b_bytes)
    b_cap = max(1, min(B, cap_by_budget, cap_by_target))
    b_blk = _largest_divisor_leq(B, b_cap) or 1
    n_bblk = B // b_blk

    # 2-way split of the reduction space for megacore (v7x); harmless on 1 TC.
    if n_tiles % 2 == 0 and n_tiles >= 2:
        split_axis, n_split = "tile", 2
    elif n_bblk % 2 == 0 and n_bblk >= 2:
        split_axis, n_split = "batch", 2
    elif n_bblk == 1 and B % 2 == 0 and B >= 2:
        b_blk = B // 2
        n_bblk = 2
        split_axis, n_split = "batch", 2
    else:
        split_axis, n_split = None, 1

    return b_blk, tile, n_bblk, n_tiles, split_axis, n_split


def _ema_sum_kernel(x_ref, partial_ref, acc_ref, *, n_chunks, chunk):
    # x_ref       : (B_BLK, C, TILE)      VMEM (native dtype)
    # partial_ref : (1, C, 1)      f32    VMEM output (per-split channel sums)
    # acc_ref     : (C, chunk)     f32    VMEM scratch (narrow accumulator)
    b = pl.program_id(1)
    t = pl.program_id(2)
    first = jnp.logical_and(b == 0, t == 0)
    last = jnp.logical_and(b == pl.num_programs(1) - 1,
                           t == pl.num_programs(2) - 1)

    @pl.when(first)
    def _init():
        acc_ref[...] = jnp.zeros_like(acc_ref)

    # Fold batch rows + lane chunks into the narrow accumulator with pure VPU
    # adds.  Slices are static and vreg-aligned (chunk == 128 when TILE % 128
    # == 0), so no relayout; the single cross-lane reduce waits for finalize.
    def chunk_sum(k):
        return jnp.sum(
            x_ref[:, :, k * chunk:(k + 1) * chunk].astype(jnp.float32), axis=0)

    part = chunk_sum(0)
    for k in range(1, n_chunks):
        part = part + chunk_sum(k)
    acc_ref[...] += part

    @pl.when(last)
    def _finalize():
        partial_ref[0, :, :] = jnp.sum(acc_ref[...], axis=-1, keepdims=True)


def ema_forward(x, ema_state, decay=0.999, training=True):
    """x: (B, C, H, W) (NCHW). ema_state: (1, C, 1, 1) float32.
       Returns (ema_output (B, C, H, W) f32, new_ema_state (1, C, 1, 1) f32)."""
    B, C, H, W = x.shape
    HW = H * W
    state = ema_state.reshape(1, C, 1, 1).astype(jnp.float32)

    if not training:
        # PyTorch eval path: no state update, never reads x.
        return jnp.broadcast_to(state, (B, C, H, W)), state

    x3 = x.reshape(B, C, HW)  # free reshape; native layout, native dtype (bf16 OK)
    itemsize = jnp.dtype(x.dtype).itemsize
    x_budget, vmem_limit = _vmem_budgets()
    b_blk, tile, n_bblk, n_tiles, split_axis, n_split = _choose_tiling(
        B, C, HW, itemsize, x_budget)

    chunk = 128 if tile % 128 == 0 else tile
    n_chunks = tile // chunk

    if split_axis == "tile":
        tps = n_tiles // n_split
        grid = (n_split, n_bblk, tps)
        x_map = lambda s, b, t: (b, 0, s * tps + t)
    elif split_axis == "batch":
        bps = n_bblk // n_split
        grid = (n_split, bps, n_tiles)
        x_map = lambda s, b, t: (s * bps + b, 0, t)
    else:
        grid = (1, n_bblk, n_tiles)
        x_map = lambda s, b, t: (b, 0, t)

    partials = pl.pallas_call(
        functools.partial(_ema_sum_kernel, n_chunks=n_chunks, chunk=chunk),
        grid=grid,
        in_specs=[pl.BlockSpec((b_blk, C, tile), x_map)],
        out_specs=pl.BlockSpec((1, C, 1), lambda s, b, t: (s, 0, 0)),
        out_shape=jax.ShapeDtypeStruct((n_split, C, 1), jnp.float32),
        scratch_shapes=[pltpu.VMEM((C, chunk), jnp.float32)],
        compiler_params=pltpu.CompilerParams(
            dimension_semantics=("parallel", "arbitrary", "arbitrary"),
            vmem_limit_bytes=vmem_limit,
        ),
    )(x3)

    # Tiny epilogue in the wrapper: combine per-split partials, apply decay.
    mean = jnp.sum(partials, axis=0) * (1.0 / float(B * HW))          # (C, 1)
    new_state = (decay * state.reshape(C, 1)
                 + (1.0 - decay) * mean).reshape(1, C, 1, 1)
    # Zero-information broadcast stays outside the kernel so XLA can fuse it
    # into the consumer instead of writing B*C*H*W to HBM.
    ema_output = jnp.broadcast_to(new_state, (B, C, H, W))
    return ema_output, new_state


def _reference(x, ema_state, decay):
    x_mean = x.astype(jnp.float32).mean(axis=(2, 3), keepdims=True)
    ref_state = decay * ema_state + (1.0 - decay) * x_mean.mean(axis=0, keepdims=True)
    ref_out = jnp.broadcast_to(ref_state, x.shape)
    return ref_out, ref_state


if __name__ == "__main__":
    decay = 0.999
    key = jax.random.PRNGKey(0)
    keys = jax.random.split(key, 8)

    def check(B, C, H, W, kx, ks):
        x = jax.random.normal(kx, (B, C, H, W), dtype=jnp.float32)
        state = jax.random.normal(ks, (1, C, 1, 1), dtype=jnp.float32)
        out, new_state = ema_forward(x, state, decay=decay, training=True)
        jax.block_until_ready((out, new_state))
        ref_out, ref_state = _reference(x, state, decay)
        assert out.shape == (B, C, H, W) and new_state.shape == (1, C, 1, 1)
        assert jnp.allclose(new_state, ref_state, atol=1e-5, rtol=1e-5)
        assert jnp.allclose(out, ref_out, atol=1e-5, rtol=1e-5)
        return x, state

    # Spec-sized shape (register_buffer starts at zeros like the module).
    B, C, H, W = 2, 4, 16, 16
    x = jax.random.normal(keys[0], (B, C, H, W), dtype=jnp.float32)
    ema_state = jnp.zeros((1, C, 1, 1), dtype=jnp.float32)
    out, new_state = ema_forward(x, ema_state, decay=decay, training=True)
    jax.block_until_ready((out, new_state))
    ref_out, ref_state = _reference(x, ema_state, decay)
    assert jnp.allclose(new_state, ref_state, atol=1e-5, rtol=1e-5)
    assert jnp.allclose(out, ref_out, atol=1e-5, rtol=1e-5)

    # Multi-chunk HW (64 lane chunks per tile), batch-split megacore path.
    check(2, 4, 64, 128, keys[1], keys[2])
    # Batch-blocked path (B_BLK > 1) with a 2-way batch split.
    check(4, 4, 16, 16, keys[3], keys[4])
    # Odd HW fallback (tile == HW, no 128 alignment) and no-split path (odd B).
    check(3, 4, 10, 10, keys[5], keys[6])
    # Multi-tile HW: 2-way split over HW tiles.
    check(2, 4, 128, 128, keys[7], keys[0])

    # Eval mode: skips the kernel entirely, state passes through unchanged.
    out_eval, state_eval = ema_forward(x, ema_state, decay=decay, training=False)
    jax.block_until_ready((out_eval, state_eval))
    assert jnp.allclose(state_eval, ema_state)
    assert jnp.allclose(out_eval, jnp.broadcast_to(ema_state, (B, C, H, W)))

    print("KERNEL_OK")
</pallas_src>

<mosaic_0001>
module attributes {stable_mosaic.version = 11 : i64} {
  func.func @_ema_sum_kernel(%arg0: i32, %arg1: i32, %arg2: i32, %arg3: memref<1x4x256xf32, #tpu.memory_space<vmem>>, %arg4: memref<1x4x1xf32, #tpu.memory_space<vmem>>, %arg5: memref<4x128xf32, #tpu.memory_space<vmem>>) attributes {dimension_semantics = [#tpu.dimension_semantics<parallel>, #tpu.dimension_semantics<arbitrary>, #tpu.dimension_semantics<arbitrary>], iteration_bounds = array<i64: 2, 1, 1>, scalar_prefetch = 0 : i64, scratch_operands = 1 : i64, tpu.core_type = #tpu.core_type<tc>, window_params = [{transform_indices = @transform_0, window_bounds = array<i64: 1, 4, 256>}, {transform_indices = @transform_1, window_bounds = array<i64: 1, 4, 1>}]} {
    %c0_i32 = arith.constant 0 : i32
    %0 = arith.cmpi eq, %arg1, %c0_i32 : i32
    %c0_i32_0 = arith.constant 0 : i32
    %1 = arith.cmpi eq, %arg2, %c0_i32_0 : i32
    %2 = arith.andi %0, %1 : i1
    %c0_i32_1 = arith.constant 0 : i32
    %3 = arith.cmpi eq, %arg1, %c0_i32_1 : i32
    %c0_i32_2 = arith.constant 0 : i32
    %4 = arith.cmpi eq, %arg2, %c0_i32_2 : i32
    %5 = arith.andi %3, %4 : i1
    %6 = arith.extui %2 : i1 to i32
    %c0_i32_3 = arith.constant 0 : i32
    %7 = arith.cmpi ne, %6, %c0_i32_3 : i32
    scf.if %7 {
      %cst_14 = arith.constant 0.000000e+00 : f32
      %18 = vector.broadcast %cst_14 : f32 to vector<4x128xf32>
      %c0_15 = arith.constant 0 : index
      %c0_16 = arith.constant 0 : index
      %19 = vector.load %arg5[%c0_15, %c0_16] : memref<4x128xf32, #tpu.memory_space<vmem>>, vector<4x128xf32>
      tpu.vector_store %arg5[%c0_15, %c0_16], %18 {strides = array<i32>} : memref<4x128xf32, #tpu.memory_space<vmem>>, vector<4x128xf32>,
    } else {
    }
    %c0 = arith.constant 0 : index
    %c0_4 = arith.constant 0 : index
    %c0_5 = arith.constant 0 : index
    %8 = vector.load %arg3[%c0, %c0_4, %c0_5] : memref<1x4x256xf32, #tpu.memory_space<vmem>>, vector<1x4x128xf32>
    %cst = arith.constant dense<0.000000e+00> : vector<4x128xf32>
    %9 = vector.multi_reduction <add>, %8, %cst [0] : vector<1x4x128xf32> to vector<4x128xf32>
    %c0_6 = arith.constant 0 : index
    %c0_7 = arith.constant 0 : index
    %c128 = arith.constant 128 : index
    %10 = vector.load %arg3[%c0_6, %c0_7, %c128] : memref<1x4x256xf32, #tpu.memory_space<vmem>>, vector<1x4x128xf32>
    %cst_8 = arith.constant dense<0.000000e+00> : vector<4x128xf32>
    %11 = vector.multi_reduction <add>, %10, %cst_8 [0] : vector<1x4x128xf32> to vector<4x128xf32>
    %12 = arith.addf %9, %11 : vector<4x128xf32>
    %c0_9 = arith.constant 0 : index
    %c0_10 = arith.constant 0 : index
    %13 = vector.load %arg5[%c0_9, %c0_10] : memref<4x128xf32, #tpu.memory_space<vmem>>, vector<4x128xf32>
    %14 = arith.addf %13, %12 : vector<4x128xf32>
    %c0_11 = arith.constant 0 : index
    %c0_12 = arith.constant 0 : index
    %15 = vector.load %arg5[%c0_11, %c0_12] : memref<4x128xf32, #tpu.memory_space<vmem>>, vector<4x128xf32>
    tpu.vector_store %arg5[%c0_11, %c0_12], %14 {strides = array<i32>} : memref<4x128xf32, #tpu.memory_space<vmem>>, vector<4x128xf32>,
    %16 = arith.extui %5 : i1 to i32
    %c0_i32_13 = arith.constant 0 : i32
    %17 = arith.cmpi ne, %16, %c0_i32_13 : i32
    scf.if %17 {
      %c0_14 = arith.constant 0 : index
      %c0_15 = arith.constant 0 : index
      %18 = vector.load %arg5[%c0_14, %c0_15] : memref<4x128xf32, #tpu.memory_space<vmem>>, vector<4x128xf32>
      %cst_16 = arith.constant dense<0.000000e+00> : vector<4xf32>
      %19 = vector.multi_reduction <add>, %18, %cst_16 [1] : vector<4x128xf32> to vector<4xf32>
      %20 = vector.shape_cast %19 : vector<4xf32> to vector<4x1xf32>
      %c0_17 = arith.constant 0 : index
      %c0_18 = arith.constant 0 : index
      %c0_19 = arith.constant 0 : index
      %21 = vector.load %arg4[%c0_17, %c0_18, %c0_19] : memref<1x4x1xf32, #tpu.memory_space<vmem>>, vector<1x4x1xf32>
      %22 = vector.shape_cast %21 : vector<1x4x1xf32> to vector<4x1xf32>
      %23 = vector.shape_cast %20 : vector<4x1xf32> to vector<1x4x1xf32>
      tpu.vector_store %arg4[%c0_17, %c0_18, %c0_19], %23 {strides = array<i32>} : memref<1x4x1xf32, #tpu.memory_space<vmem>>, vector<1x4x1xf32>,
    } else {
    }
    return
  }
  func.func @transform_0(%arg0: i32, %arg1: i32, %arg2: i32) -> (i32, i32, i32) {
    %c1_i32 = arith.constant 1 : i32
    %0 = arith.muli %arg0, %c1_i32 : i32
    %1 = arith.addi %0, %arg1 : i32
    %c0_i32 = arith.constant 0 : i32
    %c0_i32_0 = arith.constant 0 : i32
    return %1, %c0_i32, %arg2 : i32, i32, i32
  }
  func.func @transform_1(%arg0: i32, %arg1: i32, %arg2: i32) -> (i32, i32, i32) {
    %c0_i32 = arith.constant 0 : i32
    %c0_i32_0 = arith.constant 0 : i32
    %c0_i32_1 = arith.constant 0 : i32
    return %arg0, %c0_i32, %c0_i32_0 : i32, i32, i32
  }
}

</mosaic_0001>

<bundles_post_ra>
// kernel: tpu_custom_call.1
= control target key start
LH: loop header
LB: loop body
LE: loop exit
PB: predicated region body
PF: predicated region fallthrough
CT: control target
= control target key end

     0   :  { %6 = vsyncpa [#allocation4], 0  ;;  %s553_s0 = inlined_call_operand.hbm [shape: f32[2,4,256], index: 0, kind: input, shape index: {}]   ;;  %s554_s1 = inlined_call_operand.vmem [shape: f32[2,4,1], index: 1, kind: output, shape index: {}]  }
   0x1   :  { %8 = vsyncpa [#allocation4 + $0x1], 0  ;;  %s428_s6 = smov 0   ;;  %s430_s7 = smov 0  }
   0x2   :  { %s432_s8 = smov 0   ;;  %s434_s9 = smov 0  }
   0x3   :  { %s436_s10 = smov 0   ;;  %s438_s11 = smov 0  }
   0x4 LB: > { %s265_s12 = sadd.s32 4294967295, %s414_s11   ;;  %s33_s13 = sadd.s32 1, %s410_s10  ;;  %s414_s11 = sphi %s438_s11, %s14_s11   ;;  %s410_s10 = sphi %s436_s10, %s564_s10   ;;  %s406_s9 = sphi %s434_s9, %s563_s9   ;;  %s402_s8 = sphi %s432_s8, %s562_s8   ;;  %s398_s7 = sphi %s430_s7, %s561_s7   ;;  %s394_s6 = sphi %s428_s6, %s560_s6  }
   0x5   : > { %p35_p0 = scmp.ge.s32.totalorder %s33_s13, 2  ;;  %s44_s14 = sadd.s32 1, %s402_s8 }
   0x6   : > { %p51_p1 = scmp.ne.s32.totalorder %s402_s8, %s398_s7  ;;  %p52_p2 = scmp.eq.s32.totalorder %s414_s11, 0 }
   0x7   : > { %s566_s13 = smov (%p35_p0, %s33_s13), 0  ;;  %p57_p4 = scmp.ne.s32.totalorder %s398_s7, %s394_s6 }
   0x8   : > { %p464_p3 = por %p52_p2, %p51_p1  ;;  %s39_s16 = ssub.s32 %s410_s10, %s566_s13 }
   0x9   : > { %p58_p5 = scmp.eq.s32.totalorder %s265_s12, 0  ;;  %p42_p6 = scmp.eq.s32.totalorder %s39_s16, 0 }
   0xa   : > { %p284_p8 = scmp.lt.s32.totalorder %s414_s11, 2  ;;  %s107_s19 = sand.u32 1, %s402_s8  }
   0xb   : > { %p471_p7 = por %p58_p5, %p57_p4  ;;  %s277_s20 = sshll.u32 %s410_s10, 7 }
   0xc   : > { %s477_s18 = scalar_select %p42_p6, %s402_s8, %s44_s14  }
   0xd   : > { %s269_s21 = sshll.u32 %s107_s19, 3  ;;  %s484_s24 = scalar_lea.hbm %s553_s0, %s277_s20 }
   0xe   : > { %s111_s25 = scalar_lea.vmem [#allocation3], %s269_s21  ;;  %p488_p9 = pnand %p284_p8, %p464_p3 }
   0xf   : > { %s122_s26 = sshll.u32 %s111_s25, 4  ;;  %s108_s28 = scalar_lea.sflag [#allocation4], %s107_s19  ;;  %s492_s26 = int_to_ptr.vmem [resolvable:$true] %s122_s26 }
  0x10   : > { %s334_s29 = scalar_lea.hbm %s484_s24, 128  ;;  %p336_p13 = pneg %p488_p9 }
  0x11   : > { %p335_p12 = scmp.ne.s32.totalorder %s484_s24, %s334_s29  ;;  %s339_s3 = scalar_lea.hbm %s553_s0, 256 }
  0x12   : > { %p340_p2 = scmp.lt.u32.totalorder %s484_s24, %s553_s0  ;;  %p341_p3 = scmp.lt.u32.totalorder %s339_s3, %s334_s29 }
  0x13   : > { %p337_p0 = pnand %p336_p13, %p335_p12  ;;  %p343_p5 = scmp.lt.u32.totalorder %s334_s29, %s484_s24 }
  0x14   : > { %p342_p4 = por %p341_p3, %p340_p2 }
  0x15   : > { %p338_p1 = pneg %p337_p0 }
  0x16   : > { %p344_p6 = por %p343_p5, %p342_p4 }
  0x18   : > { %p345_p8 = pnand %p344_p6, %p338_p1 }
  0x1a   : > { %348 = shalt.err (!%p345_p8)
}
  0x1b   : > { %s349_s6 = scalar_lea.vmem %s492_s26, 128  ;;  %s416_s12 = smov [#allocation3]  }
  0x1c   : > { %p350_p12 = scmp.ne.s32.totalorder %s492_s26, %s349_s6  ;;  %s354_s14 = sshll.u32 %s416_s12, 4  ;;  %s355_s14 = int_to_ptr.vmem [resolvable:$false] %s354_s14 }
  0x1d   : > { %s356_s15 = scalar_lea.vmem %s355_s14, 256  ;;  %p357_p11 = scmp.lt.s32.totalorder %s492_s26, %s355_s14 }
  0x1e   : > { %p352_p0 = pnand %p350_p12, %p336_p13  ;;  %p358_p2 = scmp.lt.s32.totalorder %s356_s15, %s349_s6 }
  0x20   : > { %p353_p10 = pneg %p352_p0  ;;  %p359_p3 = por %p358_p2, %p357_p11 }
  0x22   : > { %p360_p4 = pnand %p359_p3, %p353_p10 }
  0x24   : > { %363 = shalt.err (!%p360_p4)
}
  0x25   : > { %283 = dma.hbm_to_vmem [thread:$0]  (!%p488_p9), %s484_s24, 128, %s492_s26, %s108_s28  }
  0x26   : > { %p558_p1 = scmp.lt.s32.totalorder %s414_s11, 3  ;;  %p559_p5 = scmp.ge.s32.totalorder %s414_s11, 1 }
  0x28   : > { %p128_p13 = pnand %p559_p5, %p558_p1 }
  0x29   : > { %s133_s16 = sand.u32 (!%p128_p13), 1, %s398_s7  }
  0x2a   : > { %131 = sbr.rel (%p128_p13) target bundleno = 213 (0xd5), region = 24  ;;  %s273_s19 = sshll.u32 (!%p128_p13), %s133_s16, 3 }
  0x2b   : > { %s134_s20 = scalar_lea.sflag (!%p128_p13), [#allocation4], %s133_s16  ;;  %s137_s21 = scalar_lea.vmem (!%p128_p13), [#allocation3], %s273_s19 }
  0x31   : > { %389 = dma.done.wait (%p471_p7), %s134_s20, 128  }
  0x32   : > { %391 = vsyncadd (%p471_p7), %s134_s20, 4294967168  ;;  %v417_v0 = vmov 0.0   ;;  %v168_v1 = vld [vmem:[%s137_s21] sm:$0xf]  ;;  %v170_v2 = vld [vmem:[%s137_s21 + $0x4] sm:$0xf] }
  0x33   : > { %167 = vst [vmem:[#allocation2] sm:$0xf] %v417_v0  ;;  %v172_v3 = vadd.f32 %v170_v2, %v168_v1  ;;  %vm179_vm0 = vcmask 1043456   ;;  %p157_p9 = scmp.lt.s32.totalorder %s406_s9, 1  ;;  %vm183_vm1 = vcmask 3072  }
  0x35   : > { %s568_s9 = smov (!%p157_p9, %s406_s9), 1 }
  0x36   : > { %s274_s22 = sshll.u32 %s568_s9, 2 }
  0x37   : > { %s160_s24 = scalar_lea.vmem %s554_s1, %s274_s22 }
  0x3a   : > { %v173_v4 = vld [vmem:[#allocation2] sm:$0xf] }
  0x3b   : > { %v174_v5 = vadd.f32 %v173_v4, %v172_v3 }
  0x3d   : > { %175 = vst [vmem:[#allocation2] sm:$0xf] %v174_v5 }
  0x44   : > { %v178_v6 = vld [vmem:[#allocation2] sm:$0xf] }
  0x45   : > { %v180_v7 = vsel %vm179_vm0, %v178_v6, 0.0 }
  0x46   : > { %181 = vadd.xlane.f32.xlu0 %v180_v7 }
  0xd3   : > { %v182_v8 = vpop.xlane.xlu0 %181 }
  0xd4   : > { %184 = vst.msk [vmem:[%s160_s24] sm:$0xf] %vm183_vm1, %v182_v8 }
  0xd5 PF: > { %s14_s11 = sadd.s32 1, %s414_s11   ;;  %s560_s6 = smov %s398_s7 }
  0xd6   : > { %p11_p7 = scmp.ge.s32.totalorder %s14_s11, 4   ;;  %s561_s7 = smov %s402_s8 }
  0xd7   : > { %s562_s8 = smov %s477_s18  ;;  %s563_s9 = smov %s410_s10 }
  0xd8   : > { %s564_s10 = smov %s566_s13  ;;  %13 = sbr.rel (!%p11_p7) target bundleno = 4 (0x4), region = 72 }
  0xdf   :  { %204 = vsyncpa [#allocation4], 1 }
  0xe0   :  { %206 = vsyncpa [#allocation4 + $0x1], 1 }

</bundles_post_ra>
